<compile_context>
chip_gen: v7x
topology: tpu7x:2x2x1
jax: 0.10.0
libtpu: 0.0.40
codegen_flags: <defaults>
</compile_context>

<pallas_src>
import math

import jax
import jax.numpy as jnp
from jax.experimental import pallas as pl

# ----------------------------- configuration ---------------------------------
B = 2
IMG_C, IMG_H, IMG_W = 3, 16, 16
PATCH = 4
NP_H, NP_W = IMG_H // PATCH, IMG_W // PATCH           # 4, 4
NUM_PATCH = NP_H * NP_W                                # 16
PATCH_DIM = IMG_C * PATCH * PATCH                      # 48
PATCH_REPR_DIM = 8
REPR_DIM = NUM_PATCH * PATCH_REPR_DIM                  # 128 (backbone output, flattened)
COND_DIM = 8
VIS_DIM = 32                                           # visual_feature_dim
MLP_DIMS = [32, 32, 32]
TRANSITION_DIM = 4
HORIZON_STEPS = 4
OUT_DIM = TRANSITION_DIM * HORIZON_STEPS               # 16
INPUT_DIM = VIS_DIM + COND_DIM                         # 40

STD_MIN, STD_MAX = 0.01, 1.0
LOGVAR_MIN = float(math.log(STD_MIN ** 2))
LOGVAR_MAX = float(math.log(STD_MAX ** 2))
LN_EPS = 1e-5

# ---------------------- packed-slab row layout (all sublane-aligned) ----------
K_PC = IMG_C * IMG_H * IMG_W                           # 768  fused patch-embed @ compress
_OFF_WPC = 0
_OFF_W0F = _OFF_WPC + K_PC                             # 768
_OFF_W0S = _OFF_W0F + VIS_DIM                          # 800
_OFF_W1 = _OFF_W0S + COND_DIM                          # 808
_OFF_W2 = _OFF_W1 + MLP_DIMS[0]                        # 840
_OFF_W3 = _OFF_W2 + MLP_DIMS[1]                        # 872
_OFF_WL0F = _OFF_W3 + MLP_DIMS[2]                      # 904
_OFF_WL0S = _OFF_WL0F + VIS_DIM                        # 936
_OFF_WL1 = _OFF_WL0S + COND_DIM                        # 944
_OFF_AUX = _OFF_WL1 + MLP_DIMS[2]                      # 976
SLAB_ROWS = _OFF_AUX + 8                               # 984
SLAB_COLS = 32                                         # == VIS_DIM == hidden == 2*OUT_DIM

# rows of the 8-row bias / LayerNorm block at the bottom of the slab
_AUX_BPC, _AUX_LNG, _AUX_LNB, _AUX_B0, _AUX_B1, _AUX_B2, _AUX_BL0, _AUX_BFIN = range(8)


# ------------------------------ kernel helpers --------------------------------
def _mish(x):
    # x * tanh(softplus(x)); branch-free stable softplus = max(x,0) + log1p(exp(-|x|))
    sp = jnp.maximum(x, 0.0) + jnp.log1p(jnp.exp(-jnp.abs(x)))
    return x * jnp.tanh(sp)


# -------------------------------- the kernel ----------------------------------
def gaussian_vision_mlp_kernel(p_ref, state_ref, w_ref, mean_ref, scale_ref):
    p = p_ref[...]                                 # (B, 768) raw NCHW pixels, flattened
    s = state_ref[...]                             # (B, COND_DIM)
    aux = w_ref[_OFF_AUX:_OFF_AUX + 8, :]          # (8, 32)  biases / LN params

    def bias(i):                                   # (1, 32) row; broadcasts over batch
        return aux[i:i + 1, :]

    def dot(a, b):
        return jnp.dot(a, b, preferred_element_type=jnp.float32)

    # --- backbone patch-embedding fused with compress Linear: ONE matmul ---------
    # (the NCHW -> patch permutation is baked into the weight's row order at init)
    h = dot(p, w_ref[_OFF_WPC:_OFF_WPC + K_PC, :]) + bias(_AUX_BPC)           # (B, 32)
    # LayerNorm(VIS_DIM) -> Dropout(p=0) -> ReLU
    mu = jnp.mean(h, axis=-1, keepdims=True)
    var = jnp.mean((h - mu) ** 2, axis=-1, keepdims=True)
    h = (h - mu) * jax.lax.rsqrt(var + LN_EPS)
    v = jnp.maximum(h * bias(_AUX_LNG) + bias(_AUX_LNB), 0.0)                 # (B, VIS_DIM)

    # x_encoded = [v | state]; the first Linear of each head is applied as split
    # matmuls (v-part + state-part), mathematically identical to concat-then-matmul.

    # --- mlp_mean hidden layers: [INPUT_DIM, 32, 32, 32], Mish between -----------
    m = _mish(dot(v, w_ref[_OFF_W0F:_OFF_W0F + VIS_DIM, :])
              + dot(s, w_ref[_OFF_W0S:_OFF_W0S + COND_DIM, :]) + bias(_AUX_B0))
    m = _mish(dot(m, w_ref[_OFF_W1:_OFF_W1 + MLP_DIMS[0], :]) + bias(_AUX_B1))
    m = _mish(dot(m, w_ref[_OFF_W2:_OFF_W2 + MLP_DIMS[1], :]) + bias(_AUX_B2))

    # --- mlp_logvar hidden layer: [INPUT_DIM, 32], Mish --------------------------
    lv = _mish(dot(v, w_ref[_OFF_WL0F:_OFF_WL0F + VIS_DIM, :])
               + dot(s, w_ref[_OFF_WL0S:_OFF_WL0S + COND_DIM, :]) + bias(_AUX_BL0))

    # --- fused final layers: one (B, 2*OUT_DIM) pre-activation slab --------------
    # cols [0, OUT_DIM)         = mean-head final Linear (w3 packed in cols 0:16)
    # cols [OUT_DIM, 2*OUT_DIM) = logvar-head final Linear (wl1 packed in cols 16:32)
    pre = (dot(m, w_ref[_OFF_W3:_OFF_W3 + MLP_DIMS[2], :])
           + dot(lv, w_ref[_OFF_WL1:_OFF_WL1 + MLP_DIMS[2], :]) + bias(_AUX_BFIN))
    mean_ref[...] = jnp.tanh(pre[:, :OUT_DIM])
    scale_ref[...] = jnp.exp(0.5 * jnp.clip(pre[:, OUT_DIM:], LOGVAR_MIN, LOGVAR_MAX))


# -------------------------------- wrapper --------------------------------------
@jax.jit
def gaussian_vision_mlp(rgb, state, params):
    """rgb: (B, 3, H, W) NCHW float32, state: (B, COND_DIM) float32."""
    Bn = rgb.shape[0]
    # Pure bitcast reshape: the patch permutation is absorbed into the fused weight,
    # so no transpose / concat XLA op runs outside the kernel.
    p = rgb.reshape(Bn, K_PC)                                        # (B, 768)

    # Single kernel, no grid: whole arrays are the VMEM blocks (3 input DMAs,
    # 2 tiny output DMAs).  At realistic batch sizes, tile B on a "parallel" grid axis.
    mean, scale = pl.pallas_call(
        gaussian_vision_mlp_kernel,
        out_shape=(jax.ShapeDtypeStruct((Bn, OUT_DIM), jnp.float32),
                   jax.ShapeDtypeStruct((Bn, OUT_DIM), jnp.float32)),
    )(p, state, params["slab"])
    return mean, scale


# ---------------------------- parameter init -----------------------------------
def _linear_params(key, fan_in, fan_out):
    """torch.nn.Linear-style uniform init, stored as (in, out) / (out,)."""
    bound = 1.0 / math.sqrt(fan_in)
    kw, kb = jax.random.split(key)
    w = jax.random.uniform(kw, (fan_in, fan_out), jnp.float32, -bound, bound)
    b = jax.random.uniform(kb, (fan_out,), jnp.float32, -bound, bound)
    return w, b


def init_params(key):
    ks = jax.random.split(key, 8)
    raw = {}
    raw["w_patch"], raw["b_patch"] = _linear_params(ks[0], PATCH_DIM, PATCH_REPR_DIM)
    raw["wc"], raw["bc"] = _linear_params(ks[1], REPR_DIM, VIS_DIM)
    raw["ln_g"] = jnp.ones((VIS_DIM,), jnp.float32)
    raw["ln_b"] = jnp.zeros((VIS_DIM,), jnp.float32)
    raw["w0"], raw["b0"] = _linear_params(ks[2], INPUT_DIM, MLP_DIMS[0])
    raw["w1"], raw["b1"] = _linear_params(ks[3], MLP_DIMS[0], MLP_DIMS[1])
    raw["w2"], raw["b2"] = _linear_params(ks[4], MLP_DIMS[1], MLP_DIMS[2])
    raw["w3"], raw["b3"] = _linear_params(ks[5], MLP_DIMS[2], OUT_DIM)
    raw["wl0"], raw["bl0"] = _linear_params(ks[6], INPUT_DIM, MLP_DIMS[-1])
    raw["wl1"], raw["bl1"] = _linear_params(ks[7], MLP_DIMS[-1], OUT_DIM)

    hi = jax.lax.Precision.HIGHEST
    # --- fuse backbone patch-embed with compress Linear (exact: linear ∘ linear) ---
    wc_r = raw["wc"].reshape(NUM_PATCH, PATCH_REPR_DIM, VIS_DIM)
    w_pc = jnp.einsum("de,qeo->qdo", raw["w_patch"], wc_r, precision=hi)   # (q, d, o)
    # absorb the NCHW->patch permutation: reorder rows to flat (c, h, w) pixel order,
    # so the kernel consumes rgb.reshape(B, C*H*W) directly with no wrapper transpose.
    w_pc = w_pc.reshape(NP_H, NP_W, IMG_C, PATCH, PATCH, VIS_DIM)          # (ph,pw,c,dh,dw,o)
    w_pc = jnp.transpose(w_pc, (2, 0, 3, 1, 4, 5)).reshape(K_PC, VIS_DIM)  # (c,ph,dh,pw,dw)
    b_pc = jnp.dot(raw["b_patch"], wc_r.sum(axis=0), precision=hi) + raw["bc"]

    # --- pack both heads' final Linears side by side into a 2*OUT_DIM-wide block ---
    w3p = jnp.concatenate([raw["w3"], jnp.zeros_like(raw["w3"])], axis=1)      # (32, 32)
    wl1p = jnp.concatenate([jnp.zeros_like(raw["wl1"]), raw["wl1"]], axis=1)   # (32, 32)
    b_fin = jnp.concatenate([raw["b3"], raw["bl1"]], axis=0)                   # (32,)

    aux = jnp.stack([b_pc, raw["ln_g"], raw["ln_b"], raw["b0"], raw["b1"],
                     raw["b2"], raw["bl0"], b_fin], axis=0)                    # (8, 32)

    slab = jnp.concatenate([
        w_pc,                                          # rows [   0, 768)
        raw["w0"][:VIS_DIM], raw["w0"][VIS_DIM:],      # rows [ 768, 800), [800, 808)
        raw["w1"], raw["w2"],                          # rows [ 808, 840), [840, 872)
        w3p,                                           # rows [ 872, 904)
        raw["wl0"][:VIS_DIM], raw["wl0"][VIS_DIM:],    # rows [ 904, 936), [936, 944)
        wl1p,                                          # rows [ 944, 976)
        aux,                                           # rows [ 976, 984)
    ], axis=0).astype(jnp.float32)
    assert slab.shape == (SLAB_ROWS, SLAB_COLS)

    return {"slab": slab}, raw


# ------------------------- pure-JAX reference (unfused) -------------------------
def reference_forward(rgb, state, raw):
    hi = jax.lax.Precision.HIGHEST
    hdot = lambda a, b: jnp.dot(a, b, precision=hi)
    Bn = rgb.shape[0]
    p = rgb.reshape(Bn, IMG_C, NP_H, PATCH, NP_W, PATCH)
    p = p.transpose(0, 2, 4, 1, 3, 5).reshape(Bn, NUM_PATCH, PATCH_DIM)
    feat = hdot(p, raw["w_patch"]) + raw["b_patch"]          # backbone
    feat = feat.reshape(Bn, REPR_DIM)                        # flatten(1, -1)
    h = hdot(feat, raw["wc"]) + raw["bc"]                    # compress Linear
    mu = h.mean(-1, keepdims=True)
    var = ((h - mu) ** 2).mean(-1, keepdims=True)
    h = (h - mu) / jnp.sqrt(var + LN_EPS) * raw["ln_g"] + raw["ln_b"]
    v = jnp.maximum(h, 0.0)
    x = jnp.concatenate([v, state], axis=-1)

    m = _mish(hdot(x, raw["w0"]) + raw["b0"])
    m = _mish(hdot(m, raw["w1"]) + raw["b1"])
    m = _mish(hdot(m, raw["w2"]) + raw["b2"])
    mean = jnp.tanh(hdot(m, raw["w3"]) + raw["b3"])

    lv = _mish(hdot(x, raw["wl0"]) + raw["bl0"])
    lv = hdot(lv, raw["wl1"]) + raw["bl1"]
    lv = jnp.clip(lv, LOGVAR_MIN, LOGVAR_MAX)
    return mean, jnp.exp(0.5 * lv)


# ----------------------------------- main ---------------------------------------
if __name__ == "__main__":
    key = jax.random.PRNGKey(0)
    k_params, k_rgb, k_state = jax.random.split(key, 3)

    packed, raw = init_params(k_params)
    rgb = jax.random.normal(k_rgb, (B, IMG_C, IMG_H, IMG_W), jnp.float32)    # NCHW
    state = jax.random.normal(k_state, (B, COND_DIM), jnp.float32)

    out_mean, out_scale = gaussian_vision_mlp(rgb, state, packed)
    jax.block_until_ready((out_mean, out_scale))

    assert out_mean.shape == (B, HORIZON_STEPS * TRANSITION_DIM)
    assert out_scale.shape == (B, HORIZON_STEPS * TRANSITION_DIM)
    assert bool(jnp.all(jnp.abs(out_mean) <= 1.0))
    assert bool(jnp.all((out_scale >= STD_MIN - 1e-6) & (out_scale <= STD_MAX + 1e-6)))

    # sanity check against the unfused pure-JAX reference (loose tolerance covers
    # MXU precision-mode / reassociation differences, still catches structural bugs)
    ref_mean, ref_scale = reference_forward(rgb, state, raw)
    assert bool(jnp.allclose(out_mean, ref_mean, rtol=3e-2, atol=3e-2))
    assert bool(jnp.allclose(out_scale, ref_scale, rtol=3e-2, atol=3e-2))
    print("KERNEL_OK")
</pallas_src>

<mosaic_0001>
module attributes {stable_mosaic.version = 11 : i64} {
  func.func @gaussian_vision_mlp_kernel(%arg0: memref<2x768xf32, #tpu.memory_space<vmem>>, %arg1: memref<2x8xf32, #tpu.memory_space<vmem>>, %arg2: memref<984x32xf32, #tpu.memory_space<vmem>>, %arg3: memref<2x16xf32, #tpu.memory_space<vmem>>, %arg4: memref<2x16xf32, #tpu.memory_space<vmem>>) attributes {dimension_semantics = [], scalar_prefetch = 0 : i64, scratch_operands = 0 : i64, tpu.core_type = #tpu.core_type<tc>} {
    %c0 = arith.constant 0 : index
    %c0_0 = arith.constant 0 : index
    %0 = vector.load %arg0[%c0, %c0_0] : memref<2x768xf32, #tpu.memory_space<vmem>>, vector<2x768xf32>
    %c0_1 = arith.constant 0 : index
    %c0_2 = arith.constant 0 : index
    %1 = vector.load %arg1[%c0_1, %c0_2] : memref<2x8xf32, #tpu.memory_space<vmem>>, vector<2x8xf32>
    %c976 = arith.constant 976 : index
    %c0_3 = arith.constant 0 : index
    %2 = vector.load %arg2[%c976, %c0_3] : memref<984x32xf32, #tpu.memory_space<vmem>>, vector<8x32xf32>
    %c0_4 = arith.constant 0 : index
    %c0_5 = arith.constant 0 : index
    %3 = vector.load %arg2[%c0_4, %c0_5] : memref<984x32xf32, #tpu.memory_space<vmem>>, vector<768x32xf32>
    %cst = arith.constant dense<0.000000e+00> : vector<2x32xf32>
    %4 = tpu.matmul %0, %3, %cst {dimension_numbers = #tpu.dot_dimension_numbers<[1], [0], [0], [1], [0, 0, 1, 1], [], []>} : vector<2x768xf32>, vector<768x32xf32>, vector<2x32xf32> -> vector<2x32xf32>
    %5 = vector.extract_strided_slice %2 {offsets = [0, 0], sizes = [1, 32], strides = [1, 1]} : vector<8x32xf32> to vector<1x32xf32>
    %6 = vector.broadcast %5 : vector<1x32xf32> to vector<2x32xf32>
    %7 = arith.addf %4, %6 : vector<2x32xf32>
    %cst_6 = arith.constant dense<0.000000e+00> : vector<2xf32>
    %8 = vector.multi_reduction <add>, %7, %cst_6 [1] : vector<2x32xf32> to vector<2xf32>
    %9 = vector.shape_cast %8 : vector<2xf32> to vector<2x1xf32>
    %cst_7 = arith.constant 3.200000e+01 : f32
    %10 = vector.broadcast %cst_7 : f32 to vector<2x1xf32>
    %11 = arith.divf %9, %10 : vector<2x1xf32>
    %12 = vector.broadcast %11 : vector<2x1xf32> to vector<2x32xf32>
    %13 = arith.subf %7, %12 : vector<2x32xf32>
    %14 = arith.mulf %13, %13 : vector<2x32xf32>
    %cst_8 = arith.constant dense<0.000000e+00> : vector<2xf32>
    %15 = vector.multi_reduction <add>, %14, %cst_8 [1] : vector<2x32xf32> to vector<2xf32>
    %16 = vector.shape_cast %15 : vector<2xf32> to vector<2x1xf32>
    %cst_9 = arith.constant 3.200000e+01 : f32
    %17 = vector.broadcast %cst_9 : f32 to vector<2x1xf32>
    %18 = arith.divf %16, %17 : vector<2x1xf32>
    %19 = vector.broadcast %11 : vector<2x1xf32> to vector<2x32xf32>
    %20 = arith.subf %7, %19 : vector<2x32xf32>
    %cst_10 = arith.constant 9.99999974E-6 : f32
    %21 = vector.broadcast %cst_10 : f32 to vector<2x1xf32>
    %22 = arith.addf %18, %21 : vector<2x1xf32>
    %23 = math.rsqrt %22 : vector<2x1xf32>
    %24 = vector.broadcast %23 : vector<2x1xf32> to vector<2x32xf32>
    %25 = arith.mulf %20, %24 : vector<2x32xf32>
    %26 = vector.extract_strided_slice %2 {offsets = [1, 0], sizes = [1, 32], strides = [1, 1]} : vector<8x32xf32> to vector<1x32xf32>
    %27 = vector.broadcast %26 : vector<1x32xf32> to vector<2x32xf32>
    %28 = arith.mulf %25, %27 : vector<2x32xf32>
    %29 = vector.extract_strided_slice %2 {offsets = [2, 0], sizes = [1, 32], strides = [1, 1]} : vector<8x32xf32> to vector<1x32xf32>
    %30 = vector.broadcast %29 : vector<1x32xf32> to vector<2x32xf32>
    %31 = arith.addf %28, %30 : vector<2x32xf32>
    %cst_11 = arith.constant 0.000000e+00 : f32
    %32 = vector.broadcast %cst_11 : f32 to vector<2x32xf32>
    %33 = arith.maximumf %31, %32 : vector<2x32xf32>
    %c768 = arith.constant 768 : index
    %c0_12 = arith.constant 0 : index
    %34 = vector.load %arg2[%c768, %c0_12] : memref<984x32xf32, #tpu.memory_space<vmem>>, vector<32x32xf32>
    %cst_13 = arith.constant dense<0.000000e+00> : vector<2x32xf32>
    %35 = tpu.matmul %33, %34, %cst_13 {dimension_numbers = #tpu.dot_dimension_numbers<[1], [0], [0], [1], [0, 0, 1, 1], [], []>} : vector<2x32xf32>, vector<32x32xf32>, vector<2x32xf32> -> vector<2x32xf32>
    %c800 = arith.constant 800 : index
    %c0_14 = arith.constant 0 : index
    %36 = vector.load %arg2[%c800, %c0_14] : memref<984x32xf32, #tpu.memory_space<vmem>>, vector<8x32xf32>
    %cst_15 = arith.constant dense<0.000000e+00> : vector<2x32xf32>
    %37 = tpu.matmul %1, %36, %cst_15 {dimension_numbers = #tpu.dot_dimension_numbers<[1], [0], [0], [1], [0, 0, 1, 1], [], []>} : vector<2x8xf32>, vector<8x32xf32>, vector<2x32xf32> -> vector<2x32xf32>
    %38 = arith.addf %35, %37 : vector<2x32xf32>
    %39 = vector.extract_strided_slice %2 {offsets = [3, 0], sizes = [1, 32], strides = [1, 1]} : vector<8x32xf32> to vector<1x32xf32>
    %40 = vector.broadcast %39 : vector<1x32xf32> to vector<2x32xf32>
    %41 = arith.addf %38, %40 : vector<2x32xf32>
    %cst_16 = arith.constant 0.000000e+00 : f32
    %42 = vector.broadcast %cst_16 : f32 to vector<2x32xf32>
    %43 = arith.maximumf %41, %42 : vector<2x32xf32>
    %44 = math.absf %41 : vector<2x32xf32>
    %cst_17 = arith.constant 0.000000e+00 : f32
    %45 = vector.broadcast %cst_17 : f32 to vector<2x32xf32>
    %46 = arith.subf %45, %44 : vector<2x32xf32>
    %47 = math.exp %46 : vector<2x32xf32>
    %48 = math.log1p %47 : vector<2x32xf32>
    %49 = arith.addf %43, %48 : vector<2x32xf32>
    %50 = math.tanh %49 : vector<2x32xf32>
    %51 = arith.mulf %41, %50 : vector<2x32xf32>
    %c808 = arith.constant 808 : index
    %c0_18 = arith.constant 0 : index
    %52 = vector.load %arg2[%c808, %c0_18] : memref<984x32xf32, #tpu.memory_space<vmem>>, vector<32x32xf32>
    %cst_19 = arith.constant dense<0.000000e+00> : vector<2x32xf32>
    %53 = tpu.matmul %51, %52, %cst_19 {dimension_numbers = #tpu.dot_dimension_numbers<[1], [0], [0], [1], [0, 0, 1, 1], [], []>} : vector<2x32xf32>, vector<32x32xf32>, vector<2x32xf32> -> vector<2x32xf32>
    %54 = vector.extract_strided_slice %2 {offsets = [4, 0], sizes = [1, 32], strides = [1, 1]} : vector<8x32xf32> to vector<1x32xf32>
    %55 = vector.broadcast %54 : vector<1x32xf32> to vector<2x32xf32>
    %56 = arith.addf %53, %55 : vector<2x32xf32>
    %cst_20 = arith.constant 0.000000e+00 : f32
    %57 = vector.broadcast %cst_20 : f32 to vector<2x32xf32>
    %58 = arith.maximumf %56, %57 : vector<2x32xf32>
    %59 = math.absf %56 : vector<2x32xf32>
    %cst_21 = arith.constant 0.000000e+00 : f32
    %60 = vector.broadcast %cst_21 : f32 to vector<2x32xf32>
    %61 = arith.subf %60, %59 : vector<2x32xf32>
    %62 = math.exp %61 : vector<2x32xf32>
    %63 = math.log1p %62 : vector<2x32xf32>
    %64 = arith.addf %58, %63 : vector<2x32xf32>
    %65 = math.tanh %64 : vector<2x32xf32>
    %66 = arith.mulf %56, %65 : vector<2x32xf32>
    %c840 = arith.constant 840 : index
    %c0_22 = arith.constant 0 : index
    %67 = vector.load %arg2[%c840, %c0_22] : memref<984x32xf32, #tpu.memory_space<vmem>>, vector<32x32xf32>
    %cst_23 = arith.constant dense<0.000000e+00> : vector<2x32xf32>
    %68 = tpu.matmul %66, %67, %cst_23 {dimension_numbers = #tpu.dot_dimension_numbers<[1], [0], [0], [1], [0, 0, 1, 1], [], []>} : vector<2x32xf32>, vector<32x32xf32>, vector<2x32xf32> -> vector<2x32xf32>
    %69 = vector.extract_strided_slice %2 {offsets = [5, 0], sizes = [1, 32], strides = [1, 1]} : vector<8x32xf32> to vector<1x32xf32>
    %70 = vector.broadcast %69 : vector<1x32xf32> to vector<2x32xf32>
    %71 = arith.addf %68, %70 : vector<2x32xf32>
    %cst_24 = arith.constant 0.000000e+00 : f32
    %72 = vector.broadcast %cst_24 : f32 to vector<2x32xf32>
    %73 = arith.maximumf %71, %72 : vector<2x32xf32>
    %74 = math.absf %71 : vector<2x32xf32>
    %cst_25 = arith.constant 0.000000e+00 : f32
    %75 = vector.broadcast %cst_25 : f32 to vector<2x32xf32>
    %76 = arith.subf %75, %74 : vector<2x32xf32>
    %77 = math.exp %76 : vector<2x32xf32>
    %78 = math.log1p %77 : vector<2x32xf32>
    %79 = arith.addf %73, %78 : vector<2x32xf32>
    %80 = math.tanh %79 : vector<2x32xf32>
    %81 = arith.mulf %71, %80 : vector<2x32xf32>
    %c904 = arith.constant 904 : index
    %c0_26 = arith.constant 0 : index
    %82 = vector.load %arg2[%c904, %c0_26] : memref<984x32xf32, #tpu.memory_space<vmem>>, vector<32x32xf32>
    %cst_27 = arith.constant dense<0.000000e+00> : vector<2x32xf32>
    %83 = tpu.matmul %33, %82, %cst_27 {dimension_numbers = #tpu.dot_dimension_numbers<[1], [0], [0], [1], [0, 0, 1, 1], [], []>} : vector<2x32xf32>, vector<32x32xf32>, vector<2x32xf32> -> vector<2x32xf32>
    %c936 = arith.constant 936 : index
    %c0_28 = arith.constant 0 : index
    %84 = vector.load %arg2[%c936, %c0_28] : memref<984x32xf32, #tpu.memory_space<vmem>>, vector<8x32xf32>
    %cst_29 = arith.constant dense<0.000000e+00> : vector<2x32xf32>
    %85 = tpu.matmul %1, %84, %cst_29 {dimension_numbers = #tpu.dot_dimension_numbers<[1], [0], [0], [1], [0, 0, 1, 1], [], []>} : vector<2x8xf32>, vector<8x32xf32>, vector<2x32xf32> -> vector<2x32xf32>
    %86 = arith.addf %83, %85 : vector<2x32xf32>
    %87 = vector.extract_strided_slice %2 {offsets = [6, 0], sizes = [1, 32], strides = [1, 1]} : vector<8x32xf32> to vector<1x32xf32>
    %88 = vector.broadcast %87 : vector<1x32xf32> to vector<2x32xf32>
    %89 = arith.addf %86, %88 : vector<2x32xf32>
    %cst_30 = arith.constant 0.000000e+00 : f32
    %90 = vector.broadcast %cst_30 : f32 to vector<2x32xf32>
    %91 = arith.maximumf %89, %90 : vector<2x32xf32>
    %92 = math.absf %89 : vector<2x32xf32>
    %cst_31 = arith.constant 0.000000e+00 : f32
    %93 = vector.broadcast %cst_31 : f32 to vector<2x32xf32>
    %94 = arith.subf %93, %92 : vector<2x32xf32>
    %95 = math.exp %94 : vector<2x32xf32>
    %96 = math.log1p %95 : vector<2x32xf32>
    %97 = arith.addf %91, %96 : vector<2x32xf32>
    %98 = math.tanh %97 : vector<2x32xf32>
    %99 = arith.mulf %89, %98 : vector<2x32xf32>
    %c872 = arith.constant 872 : index
    %c0_32 = arith.constant 0 : index
    %100 = vector.load %arg2[%c872, %c0_32] : memref<984x32xf32, #tpu.memory_space<vmem>>, vector<32x32xf32>
    %cst_33 = arith.constant dense<0.000000e+00> : vector<2x32xf32>
    %101 = tpu.matmul %81, %100, %cst_33 {dimension_numbers = #tpu.dot_dimension_numbers<[1], [0], [0], [1], [0, 0, 1, 1], [], []>} : vector<2x32xf32>, vector<32x32xf32>, vector<2x32xf32> -> vector<2x32xf32>
    %c944 = arith.constant 944 : index
    %c0_34 = arith.constant 0 : index
    %102 = vector.load %arg2[%c944, %c0_34] : memref<984x32xf32, #tpu.memory_space<vmem>>, vector<32x32xf32>
    %cst_35 = arith.constant dense<0.000000e+00> : vector<2x32xf32>
    %103 = tpu.matmul %99, %102, %cst_35 {dimension_numbers = #tpu.dot_dimension_numbers<[1], [0], [0], [1], [0, 0, 1, 1], [], []>} : vector<2x32xf32>, vector<32x32xf32>, vector<2x32xf32> -> vector<2x32xf32>
    %104 = arith.addf %101, %103 : vector<2x32xf32>
    %105 = vector.extract_strided_slice %2 {offsets = [7, 0], sizes = [1, 32], strides = [1, 1]} : vector<8x32xf32> to vector<1x32xf32>
    %106 = vector.broadcast %105 : vector<1x32xf32> to vector<2x32xf32>
    %107 = arith.addf %104, %106 : vector<2x32xf32>
    %108 = vector.extract_strided_slice %107 {offsets = [0, 0], sizes = [2, 16], strides = [1, 1]} : vector<2x32xf32> to vector<2x16xf32>
    %109 = math.tanh %108 : vector<2x16xf32>
    %c0_36 = arith.constant 0 : index
    %c0_37 = arith.constant 0 : index
    %110 = vector.load %arg3[%c0_36, %c0_37] : memref<2x16xf32, #tpu.memory_space<vmem>>, vector<2x16xf32>
    tpu.vector_store %arg3[%c0_36, %c0_37], %109 {strides = array<i32>} : memref<2x16xf32, #tpu.memory_space<vmem>>, vector<2x16xf32>,
    %111 = vector.extract_strided_slice %107 {offsets = [0, 16], sizes = [2, 16], strides = [1, 1]} : vector<2x32xf32> to vector<2x16xf32>
    %cst_38 = arith.constant -9.21034049 : f32
    %cst_39 = arith.constant 0.000000e+00 : f32
    %112 = vector.broadcast %cst_38 : f32 to vector<2x16xf32>
    %113 = arith.maximumf %112, %111 : vector<2x16xf32>
    %114 = vector.broadcast %cst_39 : f32 to vector<2x16xf32>
    %115 = arith.minimumf %114, %113 : vector<2x16xf32>
    %cst_40 = arith.constant 5.000000e-01 : f32
    %116 = vector.broadcast %cst_40 : f32 to vector<2x16xf32>
    %117 = arith.mulf %116, %115 : vector<2x16xf32>
    %118 = math.exp %117 : vector<2x16xf32>
    %c0_41 = arith.constant 0 : index
    %c0_42 = arith.constant 0 : index
    %119 = vector.load %arg4[%c0_41, %c0_42] : memref<2x16xf32, #tpu.memory_space<vmem>>, vector<2x16xf32>
    tpu.vector_store %arg4[%c0_41, %c0_42], %118 {strides = array<i32>} : memref<2x16xf32, #tpu.memory_space<vmem>>, vector<2x16xf32>,
    return
  }
}

</mosaic_0001>

<bundles_post_ra>
// kernel: gaussian_vision_mlp.1
= control target key start
LH: loop header
LB: loop body
LE: loop exit
PB: predicated region body
PF: predicated region fallthrough
CT: control target
= control target key end

     0   :  { %10 = vsyncpa [#allocation3], 0  ;;  %v118_v43 = vlaneseq  ;;  %v1571_v44 = vmov 1983009808   ;;  %s2073_s0 = inlined_call_operand.vmem [shape: f32[2,768], index: 0, kind: input, shape index: {}]   ;;  %s2074_s1 = inlined_call_operand.vmem [shape: f32[2,8], index: 1, kind: input, shape index: {}]   ;;  %s2075_s2 = inlined_call_operand.vmem [shape: f32[984,32], index: 2, kind: input, shape index: {}]   ;;  %s2076_s3 = inlined_call_operand.hbm [shape: f32[2,16], index: 3, kind: output, shape index: {0}]   ;;  %s2077_s4 = inlined_call_operand.hbm [shape: f32[2,16], index: 4, kind: output, shape index: {1}]  }
   0x1   :  { %v38_v0 = vld [vmem:[%s2075_s2 + $0x80] sm:$0xff]  ;;  %v39_v1 = vld [vmem:[%s2075_s2 + $0x88] sm:$0xff]  ;;  %v40_v11 = vld [vmem:[%s2075_s2 + $0x90] sm:$0xff]  ;;  %v126_v45 = vunpack.c.l.s4 %v1571_v44 }
   0x2   :  { %v22_v2 = vld [vmem:[%s2075_s2] sm:$0xff]  ;;  %v1353_v3 = vpack.c.bf16 %v39_v1, %v38_v0  ;;  %v23_v4 = vld [vmem:[%s2075_s2 + $0x8] sm:$0xff]  ;;  %v41_v13 = vld [vmem:[%s2075_s2 + $0x98] sm:$0xff]  ;;  %v1720_v59 = vshrl.u32 %v118_v43, 7 }
   0x3   :  { %v70_v5 = vld [vmem:[%s2075_s2 + $0x180] sm:$0xff]  ;;  %v71_v6 = vld [vmem:[%s2075_s2 + $0x188] sm:$0xff]  ;;  %v1355_v7 = vpack.c.bf16 %v23_v4, %v22_v2  ;;  %v24_v14 = vld [vmem:[%s2075_s2 + $0x10] sm:$0xff]  ;;  %v1357_v16 = vpack.c.bf16 %v41_v13, %v40_v11  ;;  %v127_v60 = vunpack.c.0.s8 %v126_v45 }
   0x4   :  { %v1385_v8 = vpack.c.bf16 %v71_v6, %v70_v5  ;;  %v54_v9 = vld [vmem:[%s2075_s2 + $0x100] sm:$0xff]  ;;  %v55_v10 = vld [vmem:[%s2075_s2 + $0x108] sm:$0xff]  ;;  %1354 = vmatprep.subr.bf16.mxu0 %v1353_v3  ;;  %v25_v15 = vld [vmem:[%s2075_s2 + $0x18] sm:$0xff] }
   0x5   :  { %v1387_v12 = vpack.c.bf16 %v55_v10, %v54_v9  ;;  %1356 = vmatpush3.bf16.msra.mxu0 %v1355_v7  ;;  %v1359_v17 = vpack.c.bf16 %v25_v15, %v24_v14  ;;  %v72_v18 = vld [vmem:[%s2075_s2 + $0x190] sm:$0xff]  ;;  %v73_v19 = vld [vmem:[%s2075_s2 + $0x198] sm:$0xff]  ;;  %v42_v23 = vld [vmem:[%s2075_s2 + $0xa0] sm:$0xff]  ;;  %v130_v10 = vsub.s32 %v127_v60, %v1720_v59 }
   0x6   :  { %1386 = vmatprep.subr.bf16.mxu1 %v1385_v8  ;;  %v56_v20 = vld [vmem:[%s2075_s2 + $0x110] sm:$0xff]  ;;  %v1389_v21 = vpack.c.bf16 %v73_v19, %v72_v18  ;;  %v57_v22 = vld [vmem:[%s2075_s2 + $0x118] sm:$0xff]  ;;  %v43_v24 = vld [vmem:[%s2075_s2 + $0xa8] sm:$0xff]  ;;  %1358 = vmatprep.subr.bf16.mxu0 %v1357_v16 }
   0x7   :  { %1388 = vmatpush3.bf16.msra.mxu1 %v1387_v12  ;;  %v1391_v25 = vpack.c.bf16 %v57_v22, %v56_v20  ;;  %v1361_v26 = vpack.c.bf16 %v43_v24, %v42_v23  ;;  %v26_v27 = vld [vmem:[%s2075_s2 + $0x20] sm:$0xff]  ;;  %v27_v28 = vld [vmem:[%s2075_s2 + $0x28] sm:$0xff]  ;;  %v44_v35 = vld [vmem:[%s2075_s2 + $0xb0] sm:$0xff] }
   0x8   :  { %v74_v29 = vld [vmem:[%s2075_s2 + $0x1a0] sm:$0xff]  ;;  %1390 = vmatprep.subr.bf16.mxu1 %v1389_v21  ;;  %v75_v30 = vld [vmem:[%s2075_s2 + $0x1a8] sm:$0xff]  ;;  %v1363_v33 = vpack.c.bf16 %v27_v28, %v26_v27  ;;  %v45_v36 = vld [vmem:[%s2075_s2 + $0xb8] sm:$0xff] }
   0x9   :  { %v58_v31 = vld [vmem:[%s2075_s2 + $0x120] sm:$0xff]  ;;  %v59_v32 = vld [vmem:[%s2075_s2 + $0x128] sm:$0xff]  ;;  %1360 = vmatpush3.bf16.msra.mxu0 %v1359_v17  ;;  %v1393_v34 = vpack.c.bf16 %v75_v30, %v74_v29  ;;  %v28_v37 = vld [vmem:[%s2075_s2 + $0x30] sm:$0xff]  ;;  %v1365_v39 = vpack.c.bf16 %v45_v36, %v44_v35 }
   0xa   :  { %1362 = vmatprep.subr.bf16.mxu0 %v1361_v26  ;;  %v1395_v38 = vpack.c.bf16 %v59_v32, %v58_v31  ;;  %v29_v40 = vld [vmem:[%s2075_s2 + $0x38] sm:$0xff]  ;;  %v76_v41 = vld [vmem:[%s2075_s2 + $0x1b0] sm:$0xff]  ;;  %v46_v49 = vld [vmem:[%s2075_s2 + $0xc0] sm:$0xff] }
   0xb   :  { %1392 = vmatpush3.bf16.msra.mxu1 %v1391_v25  ;;  %v77_v42 = vld [vmem:[%s2075_s2 + $0x1b8] sm:$0xff]  ;;  %v60_v47 = vld [vmem:[%s2075_s2 + $0x130] sm:$0xff]  ;;  %v47_v50 = vld [vmem:[%s2075_s2 + $0xc8] sm:$0xff]  ;;  %v1367_v51 = vpack.c.bf16 %v29_v40, %v28_v37 }
   0xc   :  { %1394 = vmatprep.subr.bf16.mxu1 %v1393_v34  ;;  %v1397_v46 = vpack.c.bf16 %v77_v42, %v76_v41  ;;  %v61_v48 = vld [vmem:[%s2075_s2 + $0x138] sm:$0xff]  ;;  %v78_v52 = vld [vmem:[%s2075_s2 + $0x1c0] sm:$0xff]  ;;  %v79_v53 = vld [vmem:[%s2075_s2 + $0x1c8] sm:$0xff]  ;;  %v1369_v55 = vpack.c.bf16 %v47_v50, %v46_v49 }
   0xd   :  { %1364 = vmatpush3.bf16.msra.mxu0 %v1363_v33  ;;  %v1399_v54 = vpack.c.bf16 %v61_v48, %v60_v47  ;;  %v30_v56 = vld [vmem:[%s2075_s2 + $0x40] sm:$0xff]  ;;  %v31_v57 = vld [vmem:[%s2075_s2 + $0x48] sm:$0xff]  ;;  %v1401_v61 = vpack.c.bf16 %v79_v53, %v78_v52  ;;  %v48_v63 = vld [vmem:[%s2075_s2 + $0xd0] sm:$0xff] }
   0xe   :  { %1366 = vmatprep.subr.bf16.mxu0 %v1365_v39  ;;  %v62_v58 = vld [vmem:[%s2075_s2 + $0x140] sm:$0xff]  ;;  %v63_v62 = vld [vmem:[%s2075_s2 + $0x148] sm:$0xff]  ;;  %v49_v0 = vld [vmem:[%s2075_s2 + $0xd8] sm:$0xff]  ;;  %v1371_v3 = vpack.c.bf16 %v31_v57, %v30_v56 }
   0xf   :  { %1396 = vmatpush3.bf16.msra.mxu1 %v1395_v38  ;;  %v80_v1 = vld [vmem:[%s2075_s2 + $0x1d0] sm:$0xff]  ;;  %v81_v2 = vld [vmem:[%s2075_s2 + $0x1d8] sm:$0xff]  ;;  %v1403_v5 = vpack.c.bf16 %v63_v62, %v62_v58  ;;  %v1373_v6 = vpack.c.bf16 %v49_v0, %v48_v63  ;;  %v50_v12 = vld [vmem:[%s2075_s2 + $0xe0] sm:$0xff] }
  0x10   :  { %1398 = vmatprep.subr.bf16.mxu1 %v1397_v46  ;;  %v32_v4 = vld [vmem:[%s2075_s2 + $0x50] sm:$0xff]  ;;  %v33_v7 = vld [vmem:[%s2075_s2 + $0x58] sm:$0xff]  ;;  %v1405_v11 = vpack.c.bf16 %v81_v2, %v80_v1  ;;  %v51_v13 = vld [vmem:[%s2075_s2 + $0xe8] sm:$0xff] }
  0x11   :  { %1368 = vmatpush3.bf16.msra.mxu0 %v1367_v51  ;;  %v64_v8 = vld [vmem:[%s2075_s2 + $0x150] sm:$0xff]  ;;  %v65_v9 = vld [vmem:[%s2075_s2 + $0x158] sm:$0xff]  ;;  %v82_v14 = vld [vmem:[%s2075_s2 + $0x1e0] sm:$0xff]  ;;  %v1375_v16 = vpack.c.bf16 %v33_v7, %v32_v4  ;;  %v1377_v19 = vpack.c.bf16 %v51_v13, %v50_v12 }
  0x12   :  { %1370 = vmatprep.subr.bf16.mxu0 %v1369_v55  ;;  %v83_v15 = vld [vmem:[%s2075_s2 + $0x1e8] sm:$0xff]  ;;  %v1407_v17 = vpack.c.bf16 %v65_v9, %v64_v8  ;;  %v18_v18 = vld [vmem:[%s2073_s0] sm:$0xff]  ;;  %v52_v27 = vld [vmem:[%s2075_s2 + $0xf0] sm:$0xff] }
  0x13   :  { %1400 = vmatpush3.bf16.msra.mxu1 %v1399_v54  ;;  %v34_v20 = vld [vmem:[%s2075_s2 + $0x60] sm:$0xff]  ;;  %v35_v21 = vld [vmem:[%s2075_s2 + $0x68] sm:$0xff]  ;;  %v131_v23 = vrot.slane %v18_v18, %v130_v10  ;;  %v124_v24 = vcombine.high %v18_v18, %v18_v18  ;;  %v1409_v25 = vpack.c.bf16 %v83_v15, %v82_v14  ;;  %v53_v28 = vld [vmem:[%s2075_s2 + $0xf8] sm:$0xff] }
  0x14   :  { %1402 = vmatprep.subr.bf16.mxu1 %v1401_v61  ;;  %v66_v22 = vld [vmem:[%s2075_s2 + $0x160] sm:$0xff]  ;;  %v67_v26 = vld [vmem:[%s2075_s2 + $0x168] sm:$0xff]  ;;  %v84_v29 = vld [vmem:[%s2075_s2 + $0x1f0] sm:$0xff]  ;;  %v1379_v33 = vpack.c.bf16 %v35_v21, %v34_v20  ;;  %v1381_v35 = vpack.c.bf16 %v53_v28, %v52_v27 }
  0x15   :  { %1372 = vmatpush3.bf16.msra.mxu0 %v1371_v3  ;;  %v85_v30 = vld [vmem:[%s2075_s2 + $0x1f8] sm:$0xff]  ;;  %v139_v31 = vcombine.high %v131_v23, %v131_v23  ;;  %v138_v32 = vrot.slane %v124_v24, %v130_v10  ;;  %v1411_v34 = vpack.c.bf16 %v67_v26, %v66_v22  ;;  %v36_v36 = vld [vmem:[%s2075_s2 + $0x70] sm:$0xff]  ;;  %v102_v42 = vld [vmem:[%s2075_s2 + $0x280] sm:$0xff] }
  0x16   :  { %1374 = vmatprep.subr.bf16.mxu0 %v1373_v6  ;;  %v37_v37 = vld [vmem:[%s2075_s2 + $0x78] sm:$0xff]  ;;  %v68_v38 = vld [vmem:[%s2075_s2 + $0x170] sm:$0xff]  ;;  %v1413_v40 = vpack.c.bf16 %v85_v30, %v84_v29  ;;  %v103_v43 = vld [vmem:[%s2075_s2 + $0x288] sm:$0xff] }
  0x17   :  { %1404 = vmatpush3.bf16.msra.mxu1 %v1403_v5  ;;  %v140_v39 = vcombine.high %v138_v32, %v138_v32  ;;  %219 = vmatprep.mubr.f32.mxu0 %v139_v31  ;;  %v69_v41 = vld [vmem:[%s2075_s2 + $0x178] sm:$0xff]  ;;  %v1383_v44 = vpack.c.bf16 %v37_v37, %v36_v36  ;;  %v1417_v46 = vpack.c.bf16 %v103_v43, %v102_v42  ;;  %v86_v47 = vld [vmem:[%s2075_s2 + $0x200] sm:$0xff]  ;;  %v87_v48 = vld [vmem:[%s2075_s2 + $0x208] sm:$0xff] }
  0x18   :  { %1406 = vmatprep.subr.bf16.mxu1 %v1405_v11  ;;  %v1415_v45 = vpack.c.bf16 %v69_v41, %v68_v38  ;;  %v104_v49 = vld [vmem:[%s2075_s2 + $0x290] sm:$0xff]  ;;  %v105_v50 = vld [vmem:[%s2075_s2 + $0x298] sm:$0xff]  ;;  %v1419_v51 = vpack.c.bf16 %v87_v48, %v86_v47  ;;  %v1129_v52 = vld.sshfl [vmem:[%s2073_s0 + $0x8] sm:$0x33 pattern:$0x76325410] }
  0x19   :  { %1376 = vmatpush3.bf16.msra.mxu0 %v1375_v16  ;;  %289 = vmatprep.mubr.f32.mxu1 %v140_v39  ;;  %v1421_v53 = vpack.c.bf16 %v105_v50, %v104_v49  ;;  %v88_v54 = vld [vmem:[%s2075_s2 + $0x210] sm:$0xff]  ;;  %v89_v55 = vld [vmem:[%s2075_s2 + $0x218] sm:$0xff]  ;;  %v148_v56 = vcombine.high %v1129_v52, %v1129_v52 }
  0x1a   :  { %1378 = vmatprep.subr.bf16.mxu0 %v1377_v19 }
  0x1b   :  { %1408 = vmatpush3.bf16.msra.mxu1 %v1407_v17 }
  0x1c   :  { %1410 = vmatprep.subr.bf16.mxu1 %v1409_v25 }
  0x1d   :  { %1380 = vmatpush3.bf16.msra.mxu0 %v1379_v33 }
  0x1e   :  { %1382 = vmatprep.subr.bf16.mxu0 %v1381_v35 }
  0x1f   :  { %1412 = vmatpush3.bf16.msra.mxu1 %v1411_v34 }
  0x20   :  { %1414 = vmatprep.subr.bf16.mxu1 %v1413_v40 }
  0x21   :  { %1384 = vmatpush3.bf16.msra.mxu0 %v1383_v44 }
  0x22   :  { %1418 = vmatprep.subr.bf16.mxu0 %v1417_v46 }
  0x23   :  { %1416 = vmatpush3.bf16.msra.mxu1 %v1415_v45 }
  0x24   :  { %11 = vsyncpa [#allocation5], 0  ;;  %v106_v57 = vld [vmem:[%s2075_s2 + $0x2a0] sm:$0xff]  ;;  %v107_v58 = vld [vmem:[%s2075_s2 + $0x2a8] sm:$0xff]  ;;  %220 = vmatmul.mubr.f32.vlgmr.msra.gmra.mrb[0].mxu0 %v131_v23  ;;  %v1423_v60 = vpack.c.bf16 %v89_v55, %v88_v54  ;;  %v120_v31 = vsub.s32 0, %v1720_v59  ;;  %vm365_vm0 = vcmask 254976  }
  0x25   :  { %1420 = vmatpush3.bf16.msra.mxu0 %v1419_v51  ;;  %v1425_v61 = vpack.c.bf16 %v107_v58, %v106_v57  ;;  %v90_v62 = vld [vmem:[%s2075_s2 + $0x220] sm:$0xff]  ;;  %v91_v63 = vld [vmem:[%s2075_s2 + $0x228] sm:$0xff]  ;;  %359 = vmatprep.mubr.f32.mxu0 %v148_v56  ;;  %v108_v0 = vld [vmem:[%s2075_s2 + $0x2b0] sm:$0xff]  ;;  %vm1573_vm1 = vmmov 0   ;;  %vm396_vm2 = vcmask 64512   ;;  %vm470_vm3 = vcmask 261120  }
  0x26   :  { %290 = vmatmul.mubr.f32.vlgmr.msra.gmra.mrb[0].mxu1 %v138_v32  ;;  %1422 = vmatprep.subr.bf16.mxu0 %v1421_v53  ;;  %v109_v1 = vld [vmem:[%s2075_s2 + $0x2b8] sm:$0xff]  ;;  %v1427_v2 = vpack.c.bf16 %v91_v63, %v90_v62  ;;  %v92_v4 = vld [vmem:[%s2075_s2 + $0x230] sm:$0xff]  ;;  %v110_v6 = vld [vmem:[%s2075_s2 + $0x2c0] sm:$0xff]  ;;  %vm1089_vm8 = vcmask 123904  }
  0x27   :  { %v1429_v3 = vpack.c.bf16 %v109_v1, %v108_v0  ;;  %v93_v5 = vld [vmem:[%s2075_s2 + $0x238] sm:$0xff]  ;;  %v111_v7 = vld [vmem:[%s2075_s2 + $0x2c8] sm:$0xff]  ;;  %v94_v10 = vld [vmem:[%s2075_s2 + $0x240] sm:$0xff] }
  0x28   :  { %v1431_v8 = vpack.c.bf16 %v93_v5, %v92_v4  ;;  %v1433_v9 = vpack.c.bf16 %v111_v7, %v110_v6  ;;  %v95_v11 = vld [vmem:[%s2075_s2 + $0x248] sm:$0xff]  ;;  %v112_v12 = vld [vmem:[%s2075_s2 + $0x2d0] sm:$0xff]  ;;  %v113_v13 = vld [vmem:[%s2075_s2 + $0x2d8] sm:$0xff] }
  0x29   :  { %1424 = vmatpush3.bf16.msra.mxu0 %v1423_v60  ;;  %v1435_v14 = vpack.c.bf16 %v95_v11, %v94_v10  ;;  %v1437_v15 = vpack.c.bf16 %v113_v13, %v112_v12  ;;  %v96_v16 = vld [vmem:[%s2075_s2 + $0x250] sm:$0xff]  ;;  %v97_v17 = vld [vmem:[%s2075_s2 + $0x258] sm:$0xff]  ;;  %v114_v18 = vld [vmem:[%s2075_s2 + $0x2e0] sm:$0xff] }
  0x2a   :  { %1426 = vmatprep.subr.bf16.mxu0 %v1425_v61  ;;  %v115_v19 = vld [vmem:[%s2075_s2 + $0x2e8] sm:$0xff]  ;;  %v1439_v20 = vpack.c.bf16 %v97_v17, %v96_v16  ;;  %v98_v22 = vld [vmem:[%s2075_s2 + $0x260] sm:$0xff]  ;;  %v116_v24 = vld [vmem:[%s2075_s2 + $0x2f0] sm:$0xff]  ;;  %v1574_v61 = vmov 0.0|0.0  }
  0x2b   :  { %v1441_v21 = vpack.c.bf16 %v115_v19, %v114_v18  ;;  %v99_v23 = vld [vmem:[%s2075_s2 + $0x268] sm:$0xff]  ;;  %v117_v25 = vld [vmem:[%s2075_s2 + $0x2f8] sm:$0xff]  ;;  %v100_v28 = vld [vmem:[%s2075_s2 + $0x270] sm:$0xff] }
  0x2c   :  { %v1443_v26 = vpack.c.bf16 %v99_v23, %v98_v22  ;;  %v1445_v27 = vpack.c.bf16 %v117_v25, %v116_v24  ;;  %v101_v29 = vld [vmem:[%s2075_s2 + $0x278] sm:$0xff]  ;;  %v1904_v32 = vld [vmem:[%s2075_s2 + $0x3d0] sm:$0xff]  ;;  %v395_v53 = vld [vmem:[%s2075_s2 + $0x320] sm:$0xff]  ;;  %v546_v25 = vsub.s32 3, %v1720_v59 }
  0x2d   :  { %1428 = vmatpush3.bf16.msra.mxu0 %v1427_v2  ;;  %v1447_v30 = vpack.c.bf16 %v101_v29, %v100_v28  ;;  %v121_v34 = vrot.slane %v1904_v32, %v120_v31  ;;  %v391_v54 = vld [vmem:[%s2075_s2 + $0x300] sm:$0xff]  ;;  %v392_v55 = vld [vmem:[%s2075_s2 + $0x308] sm:$0xff]  ;;  %v763_v60 = vld [vmem:[%s2075_s2 + $0x390] sm:$0xff] }
  0x2e   :  { %1430 = vmatprep.subr.bf16.mxu0 %v1429_v3  ;;  %v1922_v56 = vld [vmem:[%s2074_s1] sm:$0x3]  ;;  %v1450_v57 = vpack.c.bf16 %v392_v55, %v391_v54  ;;  %v762_v58 = vld [vmem:[%s2075_s2 + $0x388] sm:$0xff]  ;;  %v393_v63 = vld [vmem:[%s2075_s2 + $0x310] sm:$0xff] }
  0x2f   :  { %v1468_v62 = vpack.c.bf16 %v763_v60, %v762_v58  ;;  %v394_v0 = vld [vmem:[%s2075_s2 + $0x318] sm:$0xff]  ;;  %v765_v3 = vld [vmem:[%s2075_s2 + $0x3a0] sm:$0xff]  ;;  %v566_v19 = vld [vmem:[%s2075_s2 + $0x328] sm:$0xff]  ;;  %v572_v58 = vsub.s32 4, %v1720_v59 }
  0x30   :  { %v764_v1 = vld [vmem:[%s2075_s2 + $0x398] sm:$0xff]  ;;  %v1453_v2 = vpack.c.bf16 %v394_v0, %v393_v63  ;;  %v569_v23 = vld [vmem:[%s2075_s2 + $0x340] sm:$0xff] }
  0x31   :  { %1432 = vmatpush3.bf16.msra.mxu0 %v1431_v8  ;;  %v1471_v4 = vpack.c.bf16 %v765_v3, %v764_v1  ;;  %v382_v8 = vsub.s32 1, %v1720_v59  ;;  %v568_v22 = vld [vmem:[%s2075_s2 + $0x338] sm:$0xff]  ;;  %v667_v55 = vld [vmem:[%s2075_s2 + $0x360] sm:$0xff]  ;;  %v573_v60 = vrot.slane %v1904_v32, %v572_v58 }
  0x32   :  { %1434 = vmatprep.subr.bf16.mxu0 %v1433_v9  ;;  %v387_v9 = vsub.s32 2, %v1720_v59  ;;  %v1459_v24 = vpack.c.bf16 %v569_v23, %v568_v22  ;;  %v666_v54 = vld [vmem:[%s2075_s2 + $0x358] sm:$0xff]  ;;  %v933_v22 = vld [vmem:[%s2075_s2 + $0x3b0] sm:$0xff] }
  0x33   :  { %v383_v10 = vrot.slane %v1904_v32, %v382_v8  ;;  %v934_v23 = vld [vmem:[%s2075_s2 + $0x3b8] sm:$0xff] }
  0x34   :  { %v388_v13 = vrot.slane %v1904_v32, %v387_v9 }
  0x35   :  { %1436 = vmatpush3.bf16.msra.mxu0 %v1435_v14 }
  0x36   :  { %1438 = vmatprep.subr.bf16.mxu0 %v1437_v15 }
  0x39   :  { %1440 = vmatpush3.bf16.msra.mxu0 %v1439_v20  ;;  %v567_v20 = vld [vmem:[%s2075_s2 + $0x330] sm:$0xff] }
  0x3a   :  { %1442 = vmatprep.subr.bf16.mxu0 %v1441_v21  ;;  %v1456_v21 = vpack.c.bf16 %v567_v20, %v566_v19  ;;  %v930_v19 = vld [vmem:[%s2075_s2 + $0x370] sm:$0xff] }
  0x3d   :  { %1444 = vmatpush3.bf16.msra.mxu0 %v1443_v26  ;;  %v547_v26 = vrot.slane %v1904_v32, %v546_v25  ;;  %v935_v25 = vld [vmem:[%s2075_s2 + $0x3c0] sm:$0xff] }
  0x3e   :  { %1446 = vmatprep.subr.bf16.mxu0 %v1445_v27 }
  0x41   :  { %1448 = vmatpush3.bf16.msra.mxu0 %v1447_v30 }
  0x42   :  { %1467 = vmatprep.subr.bf16.mxu0 %v1574_v61 }
  0x44   :  { %360 = vmatmul.mubr.f32.vlgmr.msra.gmra.mrb[2].mxu0 %v1129_v52  ;;  %v1572_v52 = vmov 0.0  }
  0x45   :  { %1277 = vmatprep.subr.mxu1 %v1572_v52  ;;  %1279 = vmatprep.mubr.msk.f32.mxu1 %vm1573_vm1, %v1572_v52 }
  0x46   :  { %1278 = vmatpush3.msra.mxu1 %v395_v53  ;;  %1469 = vmatpush3.bf16.msra.mxu0 %v1468_v62 }
  0x47   :  { %1280 = vmatmul.mubr.msk.f32.vlgmr.msra.gmra.mrb[2].mxu1 %vm396_vm2, %v1922_v56  ;;  %1449 = vmatprep.subr.bf16.mxu1 %v1574_v61 }
  0x48   :  { %1451 = vmatpush3.bf16.msra.mxu1 %v1450_v57  ;;  %1470 = vmatprep.subr.bf16.mxu0 %v1574_v61  ;;  %v1465_v57 = vpack.c.bf16 %v667_v55, %v666_v54 }
  0x49   :  { %1452 = vmatprep.subr.bf16.mxu1 %v1574_v61  ;;  %1290 = vmatprep.mubr.msk.f32.mxu1 %vm1573_vm1, %v1572_v52 }
  0x4a   :  { %1328 = vmatprep.mubr.msk.f32.mxu0 %vm1573_vm1, %v1572_v52  ;;  %1472 = vmatpush3.bf16.msra.mxu0 %v1471_v4 }
  0x4b   :  { %1479 = vmatprep.subr.bf16.mxu0 %v1574_v61 }
  0x4c   :  { %1454 = vmatpush3.bf16.msra.mxu1 %v1453_v2 }
  0x4d   :  { %1455 = vmatprep.subr.bf16.mxu1 %v1574_v61 }
  0xf7   :  { %v1170_v33 = vpop.f32.mrb[0].mxu0 }
  0xf8   :  { %v1171_v35 = vpop.f32.mrb[1].mxu0 }
  0xf9   :  { %v1205_v36 = vpop.f32.mrb[0].mxu1  ;;  %v1172_v37 = vadd.f32 %v1171_v35, %v1170_v33 }
  0xfa   :  { %v1206_v38 = vpop.f32.mrb[1].mxu1 }
  0xfb   :  { %v1207_v39 = vadd.f32 %v1206_v38, %v1205_v36  ;;  %v222_v40 = vadd.f32 %v1172_v37, %v121_v34 }
  0xfd   :  { %v292_v41 = vadd.f32 %v1207_v39, %v222_v40 }
 0x117   :  { %v1240_v42 = vpop.f32.mrb[2].mxu0 }
 0x118   :  { %v1241_v43 = vpop.f32.mrb[3].mxu0 }
 0x119   :  { %v1242_v44 = vadd.f32 %v1241_v43, %v1240_v42 }
 0x11a   :  { %v466_v17 = vpop.f32.mrb[2].mxu1 }
 0x11b   :  { %v362_v45 = vadd.f32 %v1242_v44, %v292_v41  ;;  %v1281_v18 = vpop.f32.mrb[3].mxu1 }
 0x11c   :  { %v929_v18 = vld [vmem:[%s2075_s2 + $0x368] sm:$0xff] }
 0x11d   :  { %v366_v46 = vsel %vm365_vm0, %v362_v45, 0.0  ;;  %v1480_v20 = vpack.c.bf16 %v930_v19, %v929_v18 }
 0x11e   :  { %367 = vadd.xlane.f32.xlu0 %v366_v46 }
 0x1ab   :  { %v368_v47 = vpop.xlane.xlu0 %367 }
 0x1ac   :  { %v370_v48 = vmul.f32 0.03125, %v368_v47 }
 0x1ae   :  { %v371_v49 = vsub.f32 %v362_v45, %v370_v48 }
 0x1b0   :  { %v372_v50 = vmul.f32 %v371_v49, %v371_v49 }
 0x1b2   :  { %v373_v51 = vsel %vm365_vm0, %v372_v50, 0.0  ;;  %v664_v50 = vld [vmem:[%s2075_s2 + $0x348] sm:$0xff] }
 0x1b3   :  { %374 = vadd.xlane.f32.xlu0 %v373_v51  ;;  %v665_v51 = vld [vmem:[%s2075_s2 + $0x350] sm:$0xff] }
 0x1b4   :  { %v1462_v53 = vpack.c.bf16 %v665_v51, %v664_v50 }
 0x240   :  { %v375_v5 = vpop.xlane.xlu0 %374 }
 0x241   :  { %v376_v6 = vmul.f32 0.03125, %v375_v5 }
 0x243   :  { %v377_v7 = vadd.f32 1e-05, %v376_v6 }
 0x245   :  { %1493 = vrsqrt.f32 %v377_v7 }
 0x24f   :  { %v1494_v11 = vpop.eup %1493 }
 0x250   :  { %v379_v12 = vmul.f32 %v1494_v11, %v371_v49 }
 0x252   :  { %v384_v14 = vmul.f32 %v383_v10, %v379_v12 }
 0x254   :  { %v389_v15 = vadd.f32 %v388_v13, %v384_v14 }
 0x256   :  { %v390_v16 = vmax.f32 %v389_v15, 0.0 }
 0x258   :  { %1291 = vmatmul.mubr.msk.f32.vlgmr.msra.gmra.mrb[4].mxu1 %vm470_vm3, %v390_v16  ;;  %1329 = vmatmul.mubr.msk.f32.vlgmr.msra.gmra.mrb[4].mxu0 %vm470_vm3, %v390_v16 }
 0x259   :  { %1301 = vmatprep.mubr.msk.f32.mxu1 %vm1573_vm1, %v1572_v52  ;;  %1350 = vmatprep.mubr.msk.f32.mxu0 %vm1573_vm1, %v1572_v52 }
 0x25a   :  { %1457 = vmatpush3.bf16.msra.mxu1 %v1456_v21  ;;  %1481 = vmatpush3.bf16.msra.mxu0 %v1480_v20  ;;  %v931_v21 = vld [vmem:[%s2075_s2 + $0x378] sm:$0xff] }
 0x25b   :  { %1458 = vmatprep.subr.bf16.mxu1 %v1574_v61  ;;  %1482 = vmatprep.subr.bf16.mxu0 %v1574_v61 }
 0x25e   :  { %1460 = vmatpush3.bf16.msra.mxu1 %v1459_v24  ;;  %v1474_v24 = vpack.c.bf16 %v934_v23, %v933_v22 }
 0x25f   :  { %1461 = vmatprep.subr.bf16.mxu1 %v1574_v61 }
 0x32b   :  { %v540_v27 = vpop.f32.mrb[4].mxu1  ;;  %v1980_v28 = vpop.f32.mrb[4].mxu0 }
 0x32c   :  { %v541_v29 = vadd.f32 %v540_v27, %v466_v17  ;;  %v1292_v30 = vpop.f32.mrb[5].mxu1  ;;  %v1330_v31 = vpop.f32.mrb[5].mxu0  ;;  %v766_v17 = vld [vmem:[%s2075_s2 + $0x3a8] sm:$0xff] }
 0x32d   :  { %v909_v31 = vsub.s32 6, %v1720_v59 }
 0x32e   :  { %v548_v33 = vadd.f32 %v547_v26, %v541_v29  ;;  %v936_v26 = vld [vmem:[%s2075_s2 + $0x3c8] sm:$0xff]  ;;  %v670_v29 = vsub.s32 5, %v1720_v59 }
 0x32f   :  { %v1477_v27 = vpack.c.bf16 %v936_v26, %v935_v25 }
 0x330   :  { %v550_v34 = vand.u32 2147483647, %v548_v33  ;;  %v549_v45 = vmax.f32 %v548_v33, 0.0  ;;  %v671_v30 = vrot.slane %v1904_v32, %v670_v29 }
 0x332   :  { %v551_v35 = vsub.f32 0.0, %v550_v34 }
 0x334   :  { %v552_v36 = vmul.f32 1.442695, %v551_v35 }
 0x336   :  { %1495 = vpow2.f32 %v552_v36  ;;  %v910_v36 = vrot.slane %v1904_v32, %v909_v31 }
 0x340   :  { %v1496_v37 = vpop.eup %1495 }
 0x341   :  { %v554_v38 = vadd.f32 1.0, %v1496_v37  ;;  %v557_v39 = vmul.f32 -0.5, %v1496_v37  ;;  %v560_v41 = vand.u32 2147483647, %v1496_v37 }
 0x343   :  { %1497 = vlog2.f32 %v554_v38  ;;  %v558_v40 = vadd.f32 1.0, %v557_v39  ;;  %vm561_vm4 = vcmp.lt.f32.partialorder %v560_v41, 0.0004427343 }
 0x345   :  { %v559_v44 = vmul.f32 %v1496_v37, %v558_v40 }
 0x34d   :  { %v1498_v42 = vpop.eup %1497 }
 0x34e   :  { %v556_v43 = vmul.f32 0.6931472, %v1498_v42 }
 0x350   :  { %v562_v46 = vsel %vm561_vm4, %v559_v44, %v556_v43 }
 0x351   :  { %v563_v47 = vadd.f32 %v562_v46, %v549_v45 }
 0x353   :  { %1499 = vtanh.f32 %v563_v47 }
 0x35d   :  { %v1500_v48 = vpop.eup %1499 }
 0x35e   :  { %v565_v49 = vmul.f32 %v1500_v48, %v548_v33 }
 0x360   :  { %1302 = vmatmul.mubr.msk.f32.vlgmr.msra.gmra.mrb[6].mxu1 %vm470_vm3, %v565_v49 }
 0x361   :  { %1312 = vmatprep.mubr.msk.f32.mxu1 %vm1573_vm1, %v1572_v52  ;;  %1463 = vmatpush3.bf16.msra.mxu1 %v1462_v53 }
 0x362   :  { %1464 = vmatprep.subr.bf16.mxu1 %v1574_v61 }
 0x365   :  { %1466 = vmatpush3.bf16.msra.mxu1 %v1465_v57 }
 0x366   :  { %1315 = vmatprep.subr.mxu1 %v1572_v52 }
 0x433   :  { %v643_v62 = vpop.f32.mrb[6].mxu1 }
 0x434   :  { %v644_v63 = vadd.f32 %v643_v62, %v573_v60  ;;  %v1303_v0 = vpop.f32.mrb[7].mxu1 }
 0x436   :  { %v648_v1 = vand.u32 2147483647, %v644_v63  ;;  %v647_v12 = vmax.f32 %v644_v63, 0.0 }
 0x438   :  { %v649_v2 = vsub.f32 0.0, %v648_v1 }
 0x43a   :  { %v650_v3 = vmul.f32 1.442695, %v649_v2 }
 0x43c   :  { %1501 = vpow2.f32 %v650_v3 }
 0x446   :  { %v1502_v4 = vpop.eup %1501 }
 0x447   :  { %v652_v5 = vadd.f32 1.0, %v1502_v4  ;;  %v655_v6 = vmul.f32 -0.5, %v1502_v4  ;;  %v658_v8 = vand.u32 2147483647, %v1502_v4 }
 0x449   :  { %1503 = vlog2.f32 %v652_v5  ;;  %v656_v7 = vadd.f32 1.0, %v655_v6  ;;  %vm659_vm5 = vcmp.lt.f32.partialorder %v658_v8, 0.0004427343 }
 0x44b   :  { %v657_v11 = vmul.f32 %v1502_v4, %v656_v7 }
 0x453   :  { %v1504_v9 = vpop.eup %1503 }
 0x454   :  { %v654_v10 = vmul.f32 0.6931472, %v1504_v9 }
 0x456   :  { %v660_v13 = vsel %vm659_vm5, %v657_v11, %v654_v10 }
 0x457   :  { %v661_v14 = vadd.f32 %v660_v13, %v647_v12  ;;  %v1085_v13 = vsub.s32 7, %v1720_v59 }
 0x459   :  { %1505 = vtanh.f32 %v661_v14  ;;  %v1086_v14 = vrot.slane %v1904_v32, %v1085_v13 }
 0x463   :  { %v1506_v15 = vpop.eup %1505 }
 0x464   :  { %v663_v16 = vmul.f32 %v1506_v15, %v644_v63 }
 0x466   :  { %1313 = vmatmul.mubr.msk.f32.vlgmr.msra.gmra.mrb[8].mxu1 %vm470_vm3, %v663_v16 }
 0x467   :  { %1316 = vmatpush3.msra.mxu1 %v766_v17  ;;  %1317 = vmatprep.mubr.msk.f32.mxu1 %vm1573_vm1, %v1572_v52 }
 0x468   :  { %1473 = vmatprep.subr.bf16.mxu1 %v1574_v61 }
 0x46a   :  { %1318 = vmatmul.mubr.msk.f32.vlgmr.msra.gmra.mrb[10].mxu1 %vm396_vm2, %v1922_v56 }
 0x46b   :  { %1339 = vmatprep.mubr.msk.f32.mxu1 %vm1573_vm1, %v1572_v52  ;;  %v932_v52 = vld [vmem:[%s2075_s2 + $0x380] sm:$0xff]  ;;  %1475 = vmatpush3.bf16.msra.mxu1 %v1474_v24  ;;  %s1575_s2 = smov [#allocation2]  }
 0x46c   :  { %v1483_v56 = vpack.c.bf16 %v932_v52, %v931_v21  ;;  %1476 = vmatprep.subr.bf16.mxu1 %v1574_v61  ;;  %s1107_s27 = sshll.u32 %s1575_s2, 4  ;;  %s1108_s27 = int_to_ptr.vmem [resolvable:$true] %s1107_s27 }
 0x46d   :  { %s1523_s28 = scalar_lea.vmem %s1108_s27, 32  ;;  %p1528_p1 = scmp.lt.s32.totalorder %s1108_s27, %s1108_s27 }
 0x46e   :  { %1484 = vmatpush3.bf16.msra.mxu0 %v1483_v56  ;;  %p1524_p0 = scmp.ne.s32.totalorder %s1108_s27, %s1523_s28  ;;  %p1529_p2 = scmp.lt.s32.totalorder %s1523_s28, %s1523_s28 }
 0x46f   :  { %1478 = vmatpush3.bf16.msra.mxu1 %v1477_v27 }
 0x470   :  { %p1530_p3 = por %p1529_p2, %p1528_p1 }
 0x472   :  { %p1531_p4 = pnand %p1530_p3, %p1524_p0 }
 0x539   :  { %v741_v33 = vpop.f32.mrb[8].mxu1 }
 0x53a   :  { %v742_v34 = vadd.f32 %v741_v33, %v671_v30  ;;  %v1314_v35 = vpop.f32.mrb[9].mxu1 }
 0x53c   :  { %v746_v61 = vand.u32 2147483647, %v742_v34  ;;  %v745_v58 = vmax.f32 %v742_v34, 0.0 }
 0x53d   :  { %v833_v37 = vpop.f32.mrb[10].mxu1 }
 0x53e   :  { %v747_v38 = vsub.f32 0.0, %v746_v61  ;;  %v904_v39 = vadd.f32 %v1980_v28, %v833_v37  ;;  %v1319_v40 = vpop.f32.mrb[11].mxu1 }
 0x540   :  { %v748_v41 = vmul.f32 1.442695, %v747_v38  ;;  %v911_v42 = vadd.f32 %v910_v36, %v904_v39 }
 0x542   :  { %1507 = vpow2.f32 %v748_v41  ;;  %v913_v43 = vand.u32 2147483647, %v911_v42  ;;  %v912_v4 = vmax.f32 %v911_v42, 0.0 }
 0x544   :  { %v914_v44 = vsub.f32 0.0, %v913_v43 }
 0x546   :  { %v915_v45 = vmul.f32 1.442695, %v914_v44 }
 0x548   :  { %1509 = vpow2.f32 %v915_v45 }
 0x54c   :  { %v1508_v46 = vpop.eup %1507 }
 0x54d   :  { %v750_v47 = vadd.f32 1.0, %v1508_v46  ;;  %v753_v49 = vmul.f32 -0.5, %v1508_v46  ;;  %v756_v53 = vand.u32 2147483647, %v1508_v46 }
 0x54f   :  { %1511 = vlog2.f32 %v750_v47  ;;  %v754_v51 = vadd.f32 1.0, %v753_v49  ;;  %vm757_vm6 = vcmp.lt.f32.partialorder %v756_v53, 0.0004427343 }
 0x551   :  { %v755_v57 = vmul.f32 %v1508_v46, %v754_v51 }
 0x552   :  { %v1510_v48 = vpop.eup %1509 }
 0x553   :  { %v917_v50 = vadd.f32 1.0, %v1510_v48  ;;  %v920_v54 = vmul.f32 -0.5, %v1510_v48  ;;  %v923_v0 = vand.u32 2147483647, %v1510_v48 }
 0x555   :  { %1513 = vlog2.f32 %v917_v50  ;;  %v921_v62 = vadd.f32 1.0, %v920_v54  ;;  %vm924_vm7 = vcmp.lt.f32.partialorder %v923_v0, 0.0004427343 }
 0x557   :  { %v922_v3 = vmul.f32 %v1510_v48, %v921_v62 }
 0x559   :  { %v1512_v55 = vpop.eup %1511 }
 0x55a   :  { %v752_v28 = vmul.f32 0.6931472, %v1512_v55 }
 0x55c   :  { %v758_v60 = vsel %vm757_vm6, %v755_v57, %v752_v28 }
 0x55d   :  { %v759_v63 = vadd.f32 %v758_v60, %v745_v58 }
 0x55f   :  { %v1514_v1 = vpop.eup %1513  ;;  %1515 = vtanh.f32 %v759_v63 }
 0x560   :  { %v919_v2 = vmul.f32 0.6931472, %v1514_v1 }
 0x562   :  { %v925_v5 = vsel %vm924_vm7, %v922_v3, %v919_v2 }
 0x563   :  { %v926_v6 = vadd.f32 %v925_v5, %v912_v4 }
 0x565   :  { %1517 = vtanh.f32 %v926_v6 }
 0x569   :  { %v1516_v7 = vpop.eup %1515 }
 0x56a   :  { %v761_v8 = vmul.f32 %v1516_v7, %v742_v34 }
 0x56c   :  { %1351 = vmatmul.mubr.msk.f32.vlgmr.msra.gmra.mrb[6].mxu0 %vm470_vm3, %v761_v8 }
 0x56f   :  { %v1518_v9 = vpop.eup %1517 }
 0x570   :  { %v928_v10 = vmul.f32 %v1518_v9, %v911_v42 }
 0x572   :  { %1340 = vmatmul.mubr.msk.f32.vlgmr.msra.gmra.mrb[12].mxu1 %vm470_vm3, %v928_v10 }
 0x63f   :  { %v1079_v11 = vpop.f32.mrb[6].mxu0 }
 0x640   :  { %v1352_v12 = vpop.f32.mrb[7].mxu0 }
 0x645   :  { %v1006_v15 = vpop.f32.mrb[12].mxu1 }
 0x646   :  { %v1080_v16 = vadd.f32 %v1079_v11, %v1006_v15  ;;  %v1341_v17 = vpop.f32.mrb[13].mxu1 }
 0x648   :  { %v1087_v18 = vadd.f32 %v1086_v14, %v1080_v16 }
 0x64a   :  { %1519 = vtanh.f32 %v1087_v18  ;;  %v1091_v19 = vmax.f32 %v1087_v18, -9.2103405 }
 0x64c   :  { %v1092_v20 = vmin.f32 %v1091_v19, 0.0 }
 0x64e   :  { %v1093_v21 = vmul.f32 0.5, %v1092_v20 }
 0x650   :  { %v1094_v52 = vmul.f32 1.442695, %v1093_v21 }
 0x652   :  { %1521 = vpow2.f32 %v1094_v52 }
 0x654   :  { %v1520_v56 = vpop.eup %1519 }
 0x655   :  { %1090 = vst.msk [vmem:[#allocation2] sm:$0x3] %vm1089_vm8, %v1520_v56 }
 0x656   :  { %1534 = shalt.err (!%p1531_p4)
}
 0x657   :  { %s1535_s5 = scalar_lea.hbm %s2076_s3, 32 }
 0x658   :  { %p1536_p5 = scmp.ne.s32.totalorder %s2076_s3, %s1535_s5  ;;  %p1539_p6 = scmp.lt.u32.totalorder %s1535_s5, %s2076_s3 }
 0x65a   :  { %p1541_p7 = pnand %p1539_p6, %p1536_p5 }
 0x65c   :  { %1544 = shalt.err (!%p1541_p7)
}
 0x65d   :  { %1110 = dma.vmem_to_hbm [thread:$0]  %s1108_s27, 32, %s2076_s3, [#allocation3]   ;;  %v1522_v59 = vpop.eup %1521 }
 0x65e   :  { %s1576_s11 = smov 112   ;;  %s1577_s12 = smov [#allocation4]  }
 0x65f   :  { %1097 = vrot.lane.b32.xlu1 %v1522_v59, %s1576_s11  ;;  %s1117_s13 = sshll.u32 %s1577_s12, 4  ;;  %s1118_s13 = int_to_ptr.vmem [resolvable:$true] %s1117_s13 }
 0x660   :  { %s1545_s1 = scalar_lea.vmem %s1118_s13, 32  ;;  %p1550_p9 = scmp.lt.s32.totalorder %s1118_s13, %s1118_s13 }
 0x661   :  { %p1546_p8 = scmp.ne.s32.totalorder %s1118_s13, %s1545_s1  ;;  %p1551_p10 = scmp.lt.s32.totalorder %s1545_s1, %s1545_s1 }
 0x663   :  { %p1552_p11 = por %p1551_p10, %p1550_p9 }
 0x665   :  { %p1553_p12 = pnand %p1552_p11, %p1546_p8 }
 0x6d1   :  { %v1098_v32 = vpop.permute.xlu1 %1097 }
 0x6d2   :  { %1100 = vst.msk [vmem:[#allocation4] sm:$0x3] %vm1089_vm8, %v1098_v32 }
 0x6d3   :  { %1556 = shalt.err (!%p1553_p12)
}
 0x6d4   :  { %s1557_s3 = scalar_lea.hbm %s2077_s4, 32 }
 0x6d5   :  { %p1558_p13 = scmp.ne.s32.totalorder %s2077_s4, %s1557_s3  ;;  %p1561_p0 = scmp.lt.u32.totalorder %s1557_s3, %s2077_s4 }
 0x6d7   :  { %p1563_p1 = pnand %p1561_p0, %p1558_p13 }
 0x6d9   :  { %1566 = shalt.err (!%p1563_p1)
}
 0x6da   :  { %1120 = dma.vmem_to_hbm [thread:$0]  %s1118_s13, 32, %s2077_s4, [#allocation5]  }
 0x6db   :  { %1567 = dma.done.wait [#allocation3], 32  }
 0x6dc   :  { %1568 = vsyncadd [#allocation3], 4294967264 }
 0x6dd   :  { %1569 = dma.done.wait [#allocation5], 32  }
 0x6de   :  { %1570 = vsyncadd [#allocation5], 4294967264 }
 0x6df   :  { %1127 = vsyncpa [#allocation3], 1 }
 0x6e0   :  { %1128 = vsyncpa [#allocation5], 1 }

</bundles_post_ra>
